<compile_context>
chip_gen: v5e
topology: v5e:2x2
jax: 0.10.0
libtpu: 0.0.40
codegen_flags: <defaults>
</compile_context>

<pallas_src>
import functools

import jax
import jax.numpy as jnp
from jax.experimental import pallas as pl
from jax.experimental.pallas import tpu as pltpu

_LANE = 128
_CHUNK = 128  # register-resident row chunk (multiple of every sublane packing)


def _round_up(x, m):
    return ((x + m - 1) // m) * m


def _choose_tiling(rows, num_layers, in_itemsize, out_itemsize):
    """Pick (tm, chunk, vmem_limit_bytes) with a per-chip VMEM budget."""
    sublane = {4: 8, 2: 16, 1: 32}.get(in_itemsize, 8)

    # Per-generation budget: v5e/v6e have 128 MiB VMEM; v7x has 64 MiB per TC.
    try:
        info = pltpu.get_tpu_info()
        vmem_cap = int(getattr(info, "vmem_capacity_bytes", 64 << 20))
    except Exception:
        vmem_cap = 64 << 20
    if vmem_cap >= (100 << 20):  # v5e / v6e
        budget_bytes = 40 << 20
        tm_cap = 2048
        vmem_limit = 96 << 20
    else:                        # v7x or unknown -> conservative
        budget_bytes = 14 << 20
        tm_cap = 1024
        vmem_limit = 32 << 20

    # Double-buffered L input tiles (native dtype) + double-buffered output tile.
    per_row_bytes = 2 * _LANE * (num_layers * in_itemsize + out_itemsize)
    tm_fit = max(_CHUNK, (budget_bytes // per_row_bytes) // _CHUNK * _CHUNK)
    tm = min(tm_cap, tm_fit)

    rows_aligned = _round_up(max(rows, 1), sublane)
    if rows_aligned <= _CHUNK:
        # Tiny input: single block, single chunk, sublane-aligned.
        tm = max(rows_aligned, sublane)
        chunk = tm
    else:
        tm = min(tm, _round_up(rows_aligned, _CHUNK))  # both multiples of _CHUNK
        chunk = _CHUNK
    return tm, chunk, vmem_limit


def _featurizer_kernel(w_ref, *refs, num_layers, tm, chunk, total_rows, needs_mask):
    """Weighted sum over layers + per-block per-layer per-lane sum-of-squares.

    w_ref    : SMEM (L,)              softmax'd layer weights
    refs[:L] : VMEM (tm, 128)         one lane-dense tile per layer (native dtype)
    refs[L]  : VMEM (tm, 128)         weighted-sum output tile (out dtype)
    refs[L+1]: VMEM (1, L, 128) f32   per-block partial sum-of-squares (per lane)
    """
    x_refs = refs[:num_layers]
    feat_ref = refs[num_layers]
    psq_ref = refs[num_layers + 1]

    nchunks = tm // chunk

    if needs_mask:
        # Remaining valid rows in this tile (> tm for non-tail tiles -> mask all-true).
        rem = total_rows - pl.program_id(0) * tm
        row_ids = jax.lax.broadcasted_iota(jnp.int32, (chunk, _LANE), 0)

    # Per-layer per-lane sum-of-squares accumulators live in vregs across the tile.
    psq_acc = [jnp.zeros((1, _LANE), jnp.float32) for _ in range(num_layers)]

    for c in range(nchunks):  # static, small (<= 16) -> unrolled, bounded live ranges
        r0 = c * chunk
        if needs_mask:
            mask = row_ids < (rem - r0)
        acc = None
        for l in range(num_layers):  # L is small & static -> unrolled
            xl = x_refs[l][r0:r0 + chunk, :].astype(jnp.float32)  # upcast in vregs
            if needs_mask:
                xl = jnp.where(mask, xl, 0.0)  # zero OOB rows of the tail tile
            wl = w_ref[l]  # SMEM scalar
            acc = wl * xl if acc is None else acc + wl * xl
            # Sublane (row) reduce goes to the XLU; accumulate per-lane in vregs.
            psq_acc[l] = psq_acc[l] + jnp.sum(xl * xl, axis=0, keepdims=True)
        # Single store of the chunk's weighted sum, cast to the final output dtype.
        feat_ref[r0:r0 + chunk, :] = acc.astype(feat_ref.dtype)

    # One coalesced (L, 128) store instead of L single-sublane partial stores.
    psq_ref[0, :, :] = jnp.concatenate(psq_acc, axis=0)


def iven_featurizer_forward(features, weights_param, out_dtype=jnp.float32):
    """features: list of L arrays, each (B, T, D). weights_param: (L,).

    out_dtype defaults to float32 (matches PyTorch promotion of f32 softmax weights
    with the features); pass e.g. jnp.bfloat16 to halve the output HBM write.
    """
    num_layers = len(features)
    B, T, D = features[0].shape
    in_dtype = features[0].dtype
    in_itemsize = jnp.dtype(in_dtype).itemsize
    out_itemsize = jnp.dtype(out_dtype).itemsize
    n_elems = B * T * D

    rows = pl.cdiv(n_elems, _LANE)
    lane_pad = rows * _LANE - n_elems  # rare: only when B*T*D % 128 != 0

    def _to_slab(f):
        flat = f.reshape(-1)
        if lane_pad:
            # Zero lane pad contributes 0 to both the weighted sum and sum-of-squares.
            flat = jnp.pad(flat, (0, lane_pad))
        return flat.reshape(rows, _LANE)

    slabs = [_to_slab(f) for f in features]  # L x (rows, 128), native dtype

    tm, chunk, vmem_limit = _choose_tiling(rows, num_layers, in_itemsize, out_itemsize)
    grid0 = pl.cdiv(rows, tm)
    needs_mask = (rows % tm) != 0  # partial tail tile -> in-kernel row masking

    norm_w = jax.nn.softmax(weights_param.astype(jnp.float32))  # (L,) tiny param glue

    kernel = functools.partial(
        _featurizer_kernel,
        num_layers=num_layers,
        tm=tm,
        chunk=chunk,
        total_rows=rows,
        needs_mask=needs_mask,
    )

    feat_slab, psq = pl.pallas_call(
        kernel,
        out_shape=(
            jax.ShapeDtypeStruct((rows, _LANE), out_dtype),
            jax.ShapeDtypeStruct((grid0, num_layers, _LANE), jnp.float32),
        ),
        grid_spec=pltpu.PrefetchScalarGridSpec(
            num_scalar_prefetch=0,
            grid=(grid0,),
            in_specs=[pl.BlockSpec(memory_space=pltpu.MemorySpace.SMEM)]  # norm_w (L,)
            + [
                pl.BlockSpec((tm, _LANE), lambda i: (i, 0))               # per-layer slab
                for _ in range(num_layers)
            ],
            out_specs=[
                pl.BlockSpec((tm, _LANE), lambda i: (i, 0)),              # feature tile
                pl.BlockSpec((1, num_layers, _LANE), lambda i: (i, 0, 0)),  # partial sumsq
            ],
        ),
        compiler_params=pltpu.CompilerParams(
            dimension_semantics=("parallel",),  # no cross-step accumulation -> both v7x TCs
            vmem_limit_bytes=vmem_limit,
        ),
    )(norm_w, *slabs)

    sumsq = jnp.sum(psq, axis=(0, 2))                              # (L,)
    norm_feature = jnp.sqrt(sumsq)                                 # (L,)
    equiv_weights = norm_w * norm_feature / jnp.sum(norm_feature)  # (L,)
    if lane_pad:
        weighted_feature = feat_slab.reshape(-1)[:n_elems].reshape(B, T, D)
    else:
        weighted_feature = feat_slab.reshape(B, T, D)              # free reshape
    return weighted_feature, equiv_weights


if __name__ == "__main__":
    # Small shapes consistent with the module: L layers of (B, T, D) hidden states.
    L, B, T, D = 4, 2, 16, 32
    key = jax.random.PRNGKey(0)
    keys = jax.random.split(key, L)
    features = [jax.random.normal(k, (B, T, D), dtype=jnp.float32) for k in keys]

    # nn.Parameter(torch.zeros(layer_num)) -> deterministic zero init.
    weights_param = jnp.zeros((L,), dtype=jnp.float32)

    feat, equiv_w = iven_featurizer_forward(features, weights_param)
    feat = jax.block_until_ready(feat)
    equiv_w = jax.block_until_ready(equiv_w)

    # Pure-JAX reference check.
    x = jnp.stack(features, 0).reshape(L, -1)
    norm_w = jax.nn.softmax(weights_param)
    ref_feat = (norm_w[:, None] * x).sum(0).reshape(B, T, D)
    ref_norm = jnp.sqrt(jnp.sum(x**2, -1))
    ref_equiv = norm_w * ref_norm / jnp.sum(ref_norm)

    assert feat.shape == (B, T, D) and equiv_w.shape == (L,)
    assert jnp.allclose(feat, ref_feat, atol=1e-5, rtol=1e-5)
    assert jnp.allclose(equiv_w, ref_equiv, atol=1e-5, rtol=1e-5)

    print("KERNEL_OK")
</pallas_src>

<mosaic_0001>
module attributes {stable_mosaic.version = 11 : i64} {
  func.func @_featurizer_kernel(%arg0: i32, %arg1: memref<4xf32, #tpu.memory_space<smem>>, %arg2: memref<8x128xf32, #tpu.memory_space<vmem>>, %arg3: memref<8x128xf32, #tpu.memory_space<vmem>>, %arg4: memref<8x128xf32, #tpu.memory_space<vmem>>, %arg5: memref<8x128xf32, #tpu.memory_space<vmem>>, %arg6: memref<8x128xf32, #tpu.memory_space<vmem>>, %arg7: memref<1x4x128xf32, #tpu.memory_space<vmem>>) attributes {dimension_semantics = [#tpu.dimension_semantics<parallel>], iteration_bounds = array<i64: 1>, scalar_prefetch = 0 : i64, scratch_operands = 0 : i64, tpu.core_type = #tpu.core_type<tc>, window_params = [{transform_indices = @transform_0, window_bounds = array<i64: 4>}, {transform_indices = @transform_1, window_bounds = array<i64: 8, 128>}, {transform_indices = @transform_2, window_bounds = array<i64: 8, 128>}, {transform_indices = @transform_3, window_bounds = array<i64: 8, 128>}, {transform_indices = @transform_4, window_bounds = array<i64: 8, 128>}, {transform_indices = @transform_5, window_bounds = array<i64: 8, 128>}, {transform_indices = @transform_6, window_bounds = array<i64: 1, 4, 128>}]} {
    %cst = arith.constant 0.000000e+00 : f32
    %0 = vector.broadcast %cst : f32 to vector<1x128xf32>
    %cst_0 = arith.constant 0.000000e+00 : f32
    %1 = vector.broadcast %cst_0 : f32 to vector<1x128xf32>
    %cst_1 = arith.constant 0.000000e+00 : f32
    %2 = vector.broadcast %cst_1 : f32 to vector<1x128xf32>
    %cst_2 = arith.constant 0.000000e+00 : f32
    %3 = vector.broadcast %cst_2 : f32 to vector<1x128xf32>
    %c0 = arith.constant 0 : index
    %c0_3 = arith.constant 0 : index
    %4 = vector.load %arg2[%c0, %c0_3] : memref<8x128xf32, #tpu.memory_space<vmem>>, vector<8x128xf32>
    %c0_4 = arith.constant 0 : index
    %5 = memref.load %arg1[%c0_4] : memref<4xf32, #tpu.memory_space<smem>>
    %6 = vector.broadcast %5 : f32 to vector<8x128xf32>
    %7 = arith.mulf %6, %4 : vector<8x128xf32>
    %8 = arith.mulf %4, %4 : vector<8x128xf32>
    %cst_5 = arith.constant dense<0.000000e+00> : vector<128xf32>
    %9 = vector.multi_reduction <add>, %8, %cst_5 [0] : vector<8x128xf32> to vector<128xf32>
    %10 = vector.shape_cast %9 : vector<128xf32> to vector<1x128xf32>
    %11 = arith.addf %0, %10 : vector<1x128xf32>
    %c0_6 = arith.constant 0 : index
    %c0_7 = arith.constant 0 : index
    %12 = vector.load %arg3[%c0_6, %c0_7] : memref<8x128xf32, #tpu.memory_space<vmem>>, vector<8x128xf32>
    %c1 = arith.constant 1 : index
    %13 = memref.load %arg1[%c1] : memref<4xf32, #tpu.memory_space<smem>>
    %14 = vector.broadcast %13 : f32 to vector<8x128xf32>
    %15 = arith.mulf %14, %12 : vector<8x128xf32>
    %16 = arith.addf %7, %15 : vector<8x128xf32>
    %17 = arith.mulf %12, %12 : vector<8x128xf32>
    %cst_8 = arith.constant dense<0.000000e+00> : vector<128xf32>
    %18 = vector.multi_reduction <add>, %17, %cst_8 [0] : vector<8x128xf32> to vector<128xf32>
    %19 = vector.shape_cast %18 : vector<128xf32> to vector<1x128xf32>
    %20 = arith.addf %1, %19 : vector<1x128xf32>
    %c0_9 = arith.constant 0 : index
    %c0_10 = arith.constant 0 : index
    %21 = vector.load %arg4[%c0_9, %c0_10] : memref<8x128xf32, #tpu.memory_space<vmem>>, vector<8x128xf32>
    %c2 = arith.constant 2 : index
    %22 = memref.load %arg1[%c2] : memref<4xf32, #tpu.memory_space<smem>>
    %23 = vector.broadcast %22 : f32 to vector<8x128xf32>
    %24 = arith.mulf %23, %21 : vector<8x128xf32>
    %25 = arith.addf %16, %24 : vector<8x128xf32>
    %26 = arith.mulf %21, %21 : vector<8x128xf32>
    %cst_11 = arith.constant dense<0.000000e+00> : vector<128xf32>
    %27 = vector.multi_reduction <add>, %26, %cst_11 [0] : vector<8x128xf32> to vector<128xf32>
    %28 = vector.shape_cast %27 : vector<128xf32> to vector<1x128xf32>
    %29 = arith.addf %2, %28 : vector<1x128xf32>
    %c0_12 = arith.constant 0 : index
    %c0_13 = arith.constant 0 : index
    %30 = vector.load %arg5[%c0_12, %c0_13] : memref<8x128xf32, #tpu.memory_space<vmem>>, vector<8x128xf32>
    %c3 = arith.constant 3 : index
    %31 = memref.load %arg1[%c3] : memref<4xf32, #tpu.memory_space<smem>>
    %32 = vector.broadcast %31 : f32 to vector<8x128xf32>
    %33 = arith.mulf %32, %30 : vector<8x128xf32>
    %34 = arith.addf %25, %33 : vector<8x128xf32>
    %35 = arith.mulf %30, %30 : vector<8x128xf32>
    %cst_14 = arith.constant dense<0.000000e+00> : vector<128xf32>
    %36 = vector.multi_reduction <add>, %35, %cst_14 [0] : vector<8x128xf32> to vector<128xf32>
    %37 = vector.shape_cast %36 : vector<128xf32> to vector<1x128xf32>
    %38 = arith.addf %3, %37 : vector<1x128xf32>
    %c0_15 = arith.constant 0 : index
    %c0_16 = arith.constant 0 : index
    %39 = vector.load %arg6[%c0_15, %c0_16] : memref<8x128xf32, #tpu.memory_space<vmem>>, vector<8x128xf32>
    tpu.vector_store %arg6[%c0_15, %c0_16], %34 {strides = array<i32>} : memref<8x128xf32, #tpu.memory_space<vmem>>, vector<8x128xf32>,
    %40 = tpu.concatenate %11, %20, %29, %38 in 0 : vector<1x128xf32>, vector<1x128xf32>, vector<1x128xf32>, vector<1x128xf32> -> vector<4x128xf32>
    %c0_17 = arith.constant 0 : index
    %c0_18 = arith.constant 0 : index
    %c0_19 = arith.constant 0 : index
    %41 = vector.load %arg7[%c0_17, %c0_18, %c0_19] : memref<1x4x128xf32, #tpu.memory_space<vmem>>, vector<1x4x128xf32>
    %42 = vector.shape_cast %41 : vector<1x4x128xf32> to vector<4x128xf32>
    %43 = vector.shape_cast %40 : vector<4x128xf32> to vector<1x4x128xf32>
    tpu.vector_store %arg7[%c0_17, %c0_18, %c0_19], %43 {strides = array<i32>} : memref<1x4x128xf32, #tpu.memory_space<vmem>>, vector<1x4x128xf32>,
    return
  }
  func.func @transform_0(%arg0: i32) -> i32 {
    %c0_i32 = arith.constant 0 : i32
    %c0_i32_0 = arith.constant 0 : i32
    return %c0_i32 : i32
  }
  func.func @transform_1(%arg0: i32) -> (i32, i32) {
    %c0_i32 = arith.constant 0 : i32
    %c0_i32_0 = arith.constant 0 : i32
    return %arg0, %c0_i32 : i32, i32
  }
  func.func @transform_2(%arg0: i32) -> (i32, i32) {
    %c0_i32 = arith.constant 0 : i32
    %c0_i32_0 = arith.constant 0 : i32
    return %arg0, %c0_i32 : i32, i32
  }
  func.func @transform_3(%arg0: i32) -> (i32, i32) {
    %c0_i32 = arith.constant 0 : i32
    %c0_i32_0 = arith.constant 0 : i32
    return %arg0, %c0_i32 : i32, i32
  }
  func.func @transform_4(%arg0: i32) -> (i32, i32) {
    %c0_i32 = arith.constant 0 : i32
    %c0_i32_0 = arith.constant 0 : i32
    return %arg0, %c0_i32 : i32, i32
  }
  func.func @transform_5(%arg0: i32) -> (i32, i32) {
    %c0_i32 = arith.constant 0 : i32
    %c0_i32_0 = arith.constant 0 : i32
    return %arg0, %c0_i32 : i32, i32
  }
  func.func @transform_6(%arg0: i32) -> (i32, i32, i32) {
    %c0_i32 = arith.constant 0 : i32
    %c0_i32_0 = arith.constant 0 : i32
    %c0_i32_1 = arith.constant 0 : i32
    return %arg0, %c0_i32, %c0_i32_0 : i32, i32, i32
  }
}

</mosaic_0001>

<bundles_post_ra>
// kernel: tpu_custom_call.1
= control target key start
LH: loop header
LB: loop body
LE: loop exit
PB: predicated region body
PF: predicated region fallthrough
CT: control target
= control target key end

     0   :  { %12 = vsyncpa [#allocation5], 0  ;;  %s428_s0 = inlined_call_operand.hbm [shape: f32[4], index: 0, kind: input, shape index: {}]   ;;  %s429_s1 = inlined_call_operand.hbm [shape: f32[8,128], index: 1, kind: input, shape index: {}]   ;;  %s430_s2 = inlined_call_operand.hbm [shape: f32[8,128], index: 2, kind: input, shape index: {}]   ;;  %s431_s3 = inlined_call_operand.hbm [shape: f32[8,128], index: 3, kind: input, shape index: {}]   ;;  %s432_s4 = inlined_call_operand.hbm [shape: f32[8,128], index: 4, kind: input, shape index: {}]   ;;  %s433_s5 = inlined_call_operand.hbm [shape: f32[8,128], index: 5, kind: output, shape index: {0}]   ;;  %s434_s6 = inlined_call_operand.hbm [shape: f32[1,4,128], index: 6, kind: output, shape index: {1}]  }
   0x1   :  { %13 = vsyncpa [#allocation3], 0 }
   0x2   :  { %14 = vsyncpa [#allocation8], 0 }
   0x3   :  { %15 = vsyncpa [#allocation11], 0 }
   0x4   :  { %16 = vsyncpa [#allocation4], 0  ;;  %s43_s23 = sshll.u32 %s430_s2, 4  ;;  %s44_s23 = int_to_ptr.hbm [resolvable:$true] %s43_s23 }
   0x5   :  { %17 = vsyncpa [#allocation14], 0  ;;  %s365_s24 = smov [#allocation7]   ;;  %s23_s28 = sshll.u32 %s428_s0, 4  ;;  %s24_s28 = int_to_ptr.hbm [resolvable:$true] %s23_s28 }
   0x6   :  { %s45_s25 = sshll.u32 %s365_s24, 4  ;;  %s366_s29 = smov [#allocation2]   ;;  %s46_s25 = int_to_ptr.vmem [resolvable:$true] %s45_s25 }
   0x7   :  { %48 = dma.hbm_to_vmem [thread:$0]  %s44_s23, 128, %s46_s25, [#allocation8]  }
   0x8   :  { %26 = dma.hbm_to_smem %s24_s28, 16, %s366_s29, [#allocation5]  }
   0x9   :  { %s32_s8 = sshll.u32 %s429_s1, 4  ;;  %s367_s9 = smov [#allocation6]   ;;  %s33_s8 = int_to_ptr.hbm [resolvable:$true] %s32_s8 }
   0xa   :  { %s34_s2 = sshll.u32 %s367_s9, 4  ;;  %s54_s12 = sshll.u32 %s431_s3, 4  ;;  %s35_s2 = int_to_ptr.vmem [resolvable:$true] %s34_s2  ;;  %s55_s12 = int_to_ptr.hbm [resolvable:$true] %s54_s12 }
   0xb   :  { %37 = dma.hbm_to_vmem [thread:$0]  %s33_s8, 128, %s35_s2, [#allocation3]  }
   0xc   :  { %s368_s13 = smov [#allocation9]   ;;  %s65_s16 = sshll.u32 %s432_s4, 4  ;;  %s66_s16 = int_to_ptr.hbm [resolvable:$true] %s65_s16 }
   0xd   :  { %s56_s0 = sshll.u32 %s368_s13, 4  ;;  %s369_s1 = smov [#allocation10]   ;;  %s57_s0 = int_to_ptr.vmem [resolvable:$true] %s56_s0 }
   0xe   :  { %59 = dma.hbm_to_vmem [thread:$0]  %s55_s12, 128, %s57_s0, [#allocation8]  }
   0xf   :  { %s67_s17 = sshll.u32 %s369_s1, 4  ;;  %s68_s17 = int_to_ptr.vmem [resolvable:$true] %s67_s17 }
  0x10   :  { %70 = dma.hbm_to_vmem [thread:$0]  %s66_s16, 128, %s68_s17, [#allocation11]  }
  0x11   :  { %353 = dma.done.wait [#allocation5], 16  }
  0x12   :  { %354 = vsyncadd [#allocation5], 4294967280 }
  0x13   :  { %355 = dma.done.wait [#allocation3], 128  }
  0x14   :  { %356 = vsyncadd [#allocation3], 4294967168 }
  0x15   :  { %357 = dma.done.wait [#allocation8], 256  }
  0x16   :  { %358 = vsyncadd [#allocation8], 4294967040 }
  0x17   :  { %359 = dma.done.wait [#allocation11], 128  }
  0x18   :  { %360 = vsyncadd [#allocation11], 4294967168 }
  0x19   :  { %91 = sfence }
  0x1a   :  { %v92_v0 = vld [vmem:[#allocation6] sm:$0xff]  ;;  %s93_s3 = sld [smem:[#allocation2]]  ;;  %v104_v1 = vld [vmem:[#allocation7] sm:$0xff]  ;;  %v117_v2 = vld [vmem:[#allocation9] sm:$0xff]  ;;  %s370_s20 = smov [#allocation12]   ;;  %vm144_vm0 = vcmask 1040384  }
  0x1b   :  { %v96_v3 = vmul.f32 %v92_v0, %v92_v0  ;;  %s187_s4 = sld [smem:[#allocation2 + $0x1]]  ;;  %v109_v4 = vmul.f32 %v104_v1, %v104_v1  ;;  %v122_v5 = vmul.f32 %v117_v2, %v117_v2  ;;  %v130_v6 = vld [vmem:[#allocation10] sm:$0xff]  ;;  %s156_s21 = sshll.u32 %s370_s20, 4  ;;  %vm146_vm1 = vcmask 1041408   ;;  %s157_s21 = int_to_ptr.vmem [resolvable:$true] %s156_s21 }
  0x1c   :  { %s188_s18 = sld [smem:[#allocation2 + $0x2]]  ;;  %v135_v7 = vmul.f32 %v130_v6, %v130_v6  ;;  %s158_s24 = sshll.u32 %s433_s5, 4  ;;  %vm148_vm2 = vcmask 1042432   ;;  %s159_s24 = int_to_ptr.hbm [resolvable:$true] %s158_s24 }
  0x1d   :  { %v97_v8 = vrot.slane %v96_v3, 4  ;;  %v110_v9 = vrot.slane %v109_v4, 4  ;;  %v123_v10 = vrot.slane %v122_v5, 4  ;;  %s189_s19 = sld [smem:[#allocation2 + $0x3]]  ;;  %s371_s25 = smov [#allocation13]  }
  0x1e   :  { %v136_v11 = vrot.slane %v135_v7, 4  ;;  %s167_s26 = sshll.u32 %s371_s25, 4  ;;  %s169_s29 = sshll.u32 %s434_s6, 4  ;;  %s168_s26 = int_to_ptr.vmem [resolvable:$true] %s167_s26  ;;  %s170_s29 = int_to_ptr.hbm [resolvable:$true] %s169_s29 }
  0x1f   :  { %v98_v12 = vadd.f32 %v97_v8, %v96_v3  ;;  %v111_v13 = vadd.f32 %v110_v9, %v109_v4  ;;  %v124_v14 = vadd.f32 %v123_v10, %v122_v5 }
  0x20   :  { %v94_v15 = vstv %s93_s3  ;;  %v137_v16 = vadd.f32 %v136_v11, %v135_v7 }
  0x21   :  { %v95_v17 = vmul.f32 %v94_v15, %v92_v0  ;;  %v99_v18 = vrot.slane %v98_v12, 2  ;;  %v106_v19 = vstv %s187_s4  ;;  %v112_v20 = vrot.slane %v111_v13, 2 }
  0x22   :  { %v107_v21 = vmul.f32 %v106_v19, %v104_v1  ;;  %v119_v22 = vstv %s188_s18  ;;  %v125_v23 = vrot.slane %v124_v14, 2  ;;  %v138_v24 = vrot.slane %v137_v16, 2 }
  0x23   :  { %v120_v25 = vmul.f32 %v119_v22, %v117_v2  ;;  %v132_v26 = vstv %s189_s19  ;;  %v100_v27 = vadd.f32 %v99_v18, %v98_v12  ;;  %v113_v28 = vadd.f32 %v112_v20, %v111_v13 }
  0x24   :  { %v108_v29 = vadd.f32 %v107_v21, %v95_v17  ;;  %v133_v30 = vmul.f32 %v132_v26, %v130_v6  ;;  %v126_v31 = vadd.f32 %v125_v23, %v124_v14  ;;  %v139_v32 = vadd.f32 %v138_v24, %v137_v16 }
  0x25   :  { %v101_v33 = vrot.slane %v100_v27, 1  ;;  %v114_v34 = vrot.slane %v113_v28, 1 }
  0x26   :  { %v121_v35 = vadd.f32 %v120_v25, %v108_v29  ;;  %v127_v36 = vrot.slane %v126_v31, 1  ;;  %v140_v37 = vrot.slane %v139_v32, 1 }
  0x27   :  { %v102_v38 = vadd.f32 %v101_v33, %v100_v27  ;;  %v115_v39 = vadd.f32 %v114_v34, %v113_v28 }
  0x28   :  { %v134_v40 = vadd.f32 %v133_v30, %v121_v35  ;;  %v128_v41 = vadd.f32 %v127_v36, %v126_v31  ;;  %v141_v42 = vadd.f32 %v140_v37, %v139_v32 }
  0x29   :  { %v145_v43 = vsel %vm144_vm0, %v102_v38, %v115_v39 }
  0x2a   :  { %143 = vst [vmem:[#allocation12] sm:$0xff] %v134_v40  ;;  %v147_v44 = vsel %vm146_vm1, %v145_v43, %v128_v41 }
  0x2b   :  { %v149_v45 = vsel %vm148_vm2, %v147_v44, %v141_v42  ;;  %161 = dma.vmem_to_hbm [thread:$0]  %s157_s21, 128, %s159_s24, [#allocation4]  }
  0x2c   :  { %150 = vst [vmem:[#allocation13] sm:$0xf] %v149_v45 }
  0x2d   :  { %172 = dma.vmem_to_hbm [thread:$0]  %s168_s26, 64, %s170_s29, [#allocation14]  }
  0x2e   :  { %361 = dma.done.wait [#allocation4], 128  }
  0x2f   :  { %362 = vsyncadd [#allocation4], 4294967168 }
  0x30   :  { %363 = dma.done.wait [#allocation14], 64  }
  0x31   :  { %364 = vsyncadd [#allocation14], 4294967232 }
  0x32   :  { %181 = vsyncpa [#allocation3], 1 }
  0x33   :  { %182 = vsyncpa [#allocation8], 1 }
  0x34   :  { %183 = vsyncpa [#allocation11], 1 }
  0x35   :  { %184 = vsyncpa [#allocation4], 1 }
  0x36   :  { %185 = vsyncpa [#allocation14], 1 }
  0x37   :  { %186 = vsyncpa [#allocation5], 1 }

</bundles_post_ra>
